<compile_context>
chip_gen: v5e
topology: v5e:2x2
jax: 0.10.0
libtpu: 0.0.40
codegen_flags: <defaults>
</compile_context>

<pallas_src>
import functools
import math

import jax
import jax.numpy as jnp
from jax import lax
from jax.experimental import pallas as pl
from jax.experimental.pallas import tpu as pltpu


def _round_up(x, m):
    return ((x + m - 1) // m) * m


def _pe_embed_kernel(ids_ref, seed_ref, table_ref, pe_ref, out_ref,
                     gather_buf, dma_sem=None, *, tile_s, p, training,
                     table_resident):
    """One grid step = one (seq-tile, batch) pair.

    ids_ref   : SMEM (B, S_pad) int32 token ids   (scalar-prefetched)
    seed_ref  : SMEM (1,)       int32 dropout seed (scalar-prefetched)
    table_ref : VMEM (V+1, D) resident table (fast path) OR raw HBM ref
    pe_ref    : VMEM (tile_s, D) positional-encoding block (constant across b)
    out_ref   : VMEM (1, tile_s, D) output block
    """
    s = pl.program_id(0)
    b = pl.program_id(1)
    s_base = s * tile_s
    unroll = min(tile_s, 8)

    if table_resident:
        # Table lives in VMEM (constant index_map -> fetched once); gather the
        # tile's rows with scalar-indexed VMEM loads (vld-slot work only).
        def gather_row(r, carry):
            row = ids_ref[b, s_base + r]
            gather_buf[r, :] = table_ref[row, :]
            return carry
        lax.fori_loop(0, tile_s, gather_row, 0, unroll=unroll)
    else:
        # Fallback: table stays in HBM; DMA-gather the tile's rows.
        # TODO(synk): double-buffer this gather across grid steps (shape
        # (2, tile_s, D) + per-slot sems) to hide DMA latency behind compute.
        def issue(r, carry):
            row = ids_ref[b, s_base + r]
            pltpu.make_async_copy(table_ref.at[pl.ds(row, 1), :],
                                  gather_buf.at[pl.ds(r, 1), :],
                                  dma_sem).start()
            return carry
        lax.fori_loop(0, tile_s, issue, 0, unroll=unroll)

        def drain(r, carry):
            # Reconstruct the *real* descriptor (same src row) for the wait.
            row = ids_ref[b, s_base + r]
            pltpu.make_async_copy(table_ref.at[pl.ds(row, 1), :],
                                  gather_buf.at[pl.ds(r, 1), :],
                                  dma_sem).wait()
            return carry
        lax.fori_loop(0, tile_s, drain, 0, unroll=unroll)

    # Embedding + positional encoding: flat 2-D f32 VPU add.
    out = gather_buf[...].astype(jnp.float32) + pe_ref[...]

    if training and p > 0.0:
        if p >= 1.0:
            out = jnp.zeros_like(out)          # dropout(p=1) zeroes everything
        else:
            # Per-(s, b) seed so every tile draws an independent mask.
            pltpu.prng_seed(seed_ref[0] + s * pl.num_programs(1) + b)
            bits = pltpu.prng_random_bits(out.shape)
            if bits.dtype != jnp.uint32:
                bits = pltpu.bitcast(bits, jnp.uint32)
            # keep w.p. (1-p); int() truncation biases keep-prob by <= 2^-32.
            threshold = jnp.uint32(int(p * (2.0 ** 32)))
            keep = bits >= threshold
            out = jnp.where(keep, out * (1.0 / (1.0 - p)), 0.0)

    out_ref[0] = out.astype(out_ref.dtype)


def positional_encoding_embeddings(ids, table, pe_full, *, p=0.1,
                                   training=False, seed=0, tile_seq=512,
                                   out_dtype=jnp.float32):
    """JAX wrapper mirroring PositionalEncodingEmbeddings.forward.

    ids:      [B, S] int32 token ids
    table:    [V+1, D] float32 embedding weights
    pe_full:  [max_len, D] float32 positional encodings
    returns:  [B, S, D] out_dtype (f32 by default; bf16 halves writeback BW)
    """
    B, S = ids.shape
    V1, D = table.shape
    out_dtype = jnp.dtype(out_dtype)

    # ---- sequence tiling ---------------------------------------------------
    if int(tile_seq) >= S:
        tile_s, s_pad = S, S                    # single seq tile, no padding
    else:
        tile_s = max(8, (int(tile_seq) // 8) * 8)   # sublane-aligned tile
        s_pad = _round_up(S, tile_s)
    n_s_tiles = s_pad // tile_s
    grid = (n_s_tiles, B)                       # batch innermost -> pe reuse

    # ---- inputs -------------------------------------------------------------
    # Clamp ids: nn.Embedding raises on OOB; we must never index out of range.
    ids_i32 = jnp.clip(ids.astype(jnp.int32), 0, V1 - 1)
    if s_pad != S:
        ids_i32 = jnp.pad(ids_i32, ((0, 0), (0, s_pad - S)))   # pad -> id 0
    # TODO(synk): for very large B*S, chunk the pallas_call (or feed ids via a
    # per-tile SMEM BlockSpec) instead of scalar-prefetching the whole array.

    # Only S rows of pe ever touch HBM (no B-fold duplication).
    pe_rows = pe_full[:S].astype(jnp.float32)
    if s_pad != S:
        pe_rows = jnp.pad(pe_rows, ((0, s_pad - S), (0, 0)))

    seed_arr = jnp.array([seed], jnp.int32)

    # ---- VMEM budgeting: resident-table fast path vs HBM-gather fallback ---
    try:
        phys_vmem = int(pltpu.get_tpu_info().vmem_capacity_bytes)
    except Exception:
        phys_vmem = 64 << 20                    # v7x worst case
    table_bytes = V1 * D * table.dtype.itemsize
    stream_bytes = (2 * tile_s * D * 4                          # pe (dbl buf)
                    + 2 * tile_s * D * out_dtype.itemsize       # out (dbl buf)
                    + tile_s * D * table.dtype.itemsize)        # gather scratch
    resident_need = 2 * table_bytes + stream_bytes              # 2x: conservative
    table_resident = resident_need <= int(0.75 * phys_vmem)

    need = resident_need if table_resident else stream_bytes
    vmem_limit = max(32 << 20,
                     min(int(need * 1.25) + (4 << 20), int(0.9 * phys_vmem)))

    kernel = functools.partial(_pe_embed_kernel, tile_s=tile_s, p=float(p),
                               training=bool(training),
                               table_resident=table_resident)

    if table_resident:
        table_spec = pl.BlockSpec((V1, D), lambda s, b, ids, sd: (0, 0))
        scratch = [pltpu.VMEM((tile_s, D), table.dtype)]
    else:
        table_spec = pl.BlockSpec(memory_space=pl.ANY)
        scratch = [pltpu.VMEM((tile_s, D), table.dtype),
                   pltpu.SemaphoreType.DMA(())]

    grid_spec = pltpu.PrefetchScalarGridSpec(
        num_scalar_prefetch=2,                  # ids + seed -> SMEM
        grid=grid,
        in_specs=[table_spec,
                  pl.BlockSpec((tile_s, D), lambda s, b, ids, sd: (s, 0))],
        out_specs=pl.BlockSpec((1, tile_s, D),
                               lambda s, b, ids, sd: (b, s, 0)),
        scratch_shapes=scratch,
    )

    table_traffic = (table_bytes if table_resident
                     else B * s_pad * D * table.dtype.itemsize)
    bytes_accessed = (table_traffic
                      + s_pad * D * 4                         # pe
                      + B * s_pad * D * out_dtype.itemsize    # output write
                      + B * s_pad * 4)                        # ids

    out = pl.pallas_call(
        kernel,
        out_shape=jax.ShapeDtypeStruct((B, s_pad, D), out_dtype),
        grid_spec=grid_spec,
        compiler_params=pltpu.CompilerParams(
            dimension_semantics=("parallel", "parallel"),
            vmem_limit_bytes=int(vmem_limit)),
        cost_estimate=pl.CostEstimate(flops=B * s_pad * D, transcendentals=0,
                                      bytes_accessed=int(bytes_accessed)),
    )(ids_i32, seed_arr, table, pe_rows)

    if s_pad != S:
        out = out[:, :S]
    return out


def make_positional_encoding(d_model, max_len):
    """Same construction as the PyTorch module's `pe` buffer ([max_len, d_model])."""
    position = jnp.arange(max_len, dtype=jnp.float32)[:, None]
    div_term = jnp.exp(jnp.arange(0, d_model, 2, dtype=jnp.float32)
                       * (-math.log(10000.0) / d_model))
    pe = jnp.zeros((max_len, d_model), jnp.float32)
    pe = pe.at[:, 0::2].set(jnp.sin(position * div_term))
    pe = pe.at[:, 1::2].set(jnp.cos(position * div_term))
    return pe


if __name__ == "__main__":
    # small, module-consistent shapes
    d_model = 32
    vocab_size = 32
    max_len = 64
    batch, seq = 2, 8

    key = jax.random.PRNGKey(0)
    k_ids, k_emb = jax.random.split(key)

    # deterministic parameter init (nn.Embedding(vocab_size + 1, d_model))
    table = jax.random.normal(k_emb, (vocab_size + 1, d_model), jnp.float32)
    pe_full = make_positional_encoding(d_model, max_len)

    # token ids in [0, vocab_size]
    ids = jax.random.randint(k_ids, (batch, seq), 0, vocab_size + 1, jnp.int32)

    # eval mode (dropout == identity), matching module.eval()
    out = positional_encoding_embeddings(ids, table, pe_full, p=0.1,
                                         training=False)
    out = jax.block_until_ready(out)

    # pure-JAX reference
    ref = table[ids] + pe_full[:seq][None, :, :]

    assert out.shape == (batch, seq, d_model), out.shape
    assert jnp.allclose(out, ref, atol=1e-5, rtol=1e-5), "mismatch vs reference"

    print("KERNEL_OK")
</pallas_src>

<mosaic_0001>
module attributes {stable_mosaic.version = 11 : i64} {
  func.func @_pe_embed_kernel(%arg0: i32, %arg1: i32, %arg2: memref<2x8xi32, #tpu.memory_space<smem>>, %arg3: memref<1xi32, #tpu.memory_space<smem>>, %arg4: memref<33x32xf32, #tpu.memory_space<vmem>>, %arg5: memref<8x32xf32, #tpu.memory_space<vmem>>, %arg6: memref<1x8x32xf32, #tpu.memory_space<vmem>>, %arg7: memref<8x32xf32, #tpu.memory_space<vmem>>) attributes {dimension_semantics = [#tpu.dimension_semantics<parallel>, #tpu.dimension_semantics<parallel>], iteration_bounds = array<i64: 1, 2>, scalar_prefetch = 2 : i64, scratch_operands = 1 : i64, tpu.core_type = #tpu.core_type<tc>, window_params = [{pipeline_mode = #tpu.pipeline_mode<synchronous>, transform_indices = @transform_0, window_bounds = array<i64: 33, 32>}, {transform_indices = @transform_1, window_bounds = array<i64: 8, 32>}, {transform_indices = @transform_2, window_bounds = array<i64: 1, 8, 32>}]} {
    %c8_i32 = arith.constant 8 : i32
    %0 = arith.muli %arg0, %c8_i32 : i32
    %c0_i32 = arith.constant 0 : i32
    %1 = arith.addi %0, %c0_i32 : i32
    %2 = arith.index_cast %arg1 : i32 to index
    %3 = arith.index_cast %1 : i32 to index
    %4 = memref.load %arg2[%2, %3] : memref<2x8xi32, #tpu.memory_space<smem>>
    %5 = arith.index_cast %4 : i32 to index
    %c0 = arith.constant 0 : index
    %6 = vector.load %arg4[%5, %c0] : memref<33x32xf32, #tpu.memory_space<vmem>>, vector<1x32xf32>
    %7 = vector.shape_cast %6 : vector<1x32xf32> to vector<32xf32>
    %8 = arith.index_cast %c0_i32 : i32 to index
    %c0_0 = arith.constant 0 : index
    %9 = vector.load %arg7[%8, %c0_0] : memref<8x32xf32, #tpu.memory_space<vmem>>, vector<1x32xf32>
    %10 = vector.shape_cast %9 : vector<1x32xf32> to vector<32xf32>
    %11 = vector.shape_cast %7 : vector<32xf32> to vector<1x32xf32>
    tpu.vector_store %arg7[%8, %c0_0], %11 {strides = array<i32>} : memref<8x32xf32, #tpu.memory_space<vmem>>, vector<1x32xf32>,
    %c1_i32 = arith.constant 1 : i32
    %12 = arith.addi %0, %c1_i32 : i32
    %13 = arith.index_cast %arg1 : i32 to index
    %14 = arith.index_cast %12 : i32 to index
    %15 = memref.load %arg2[%13, %14] : memref<2x8xi32, #tpu.memory_space<smem>>
    %16 = arith.index_cast %15 : i32 to index
    %c0_1 = arith.constant 0 : index
    %17 = vector.load %arg4[%16, %c0_1] : memref<33x32xf32, #tpu.memory_space<vmem>>, vector<1x32xf32>
    %18 = vector.shape_cast %17 : vector<1x32xf32> to vector<32xf32>
    %19 = arith.index_cast %c1_i32 : i32 to index
    %c0_2 = arith.constant 0 : index
    %20 = vector.load %arg7[%19, %c0_2] : memref<8x32xf32, #tpu.memory_space<vmem>>, vector<1x32xf32>
    %21 = vector.shape_cast %20 : vector<1x32xf32> to vector<32xf32>
    %22 = vector.shape_cast %18 : vector<32xf32> to vector<1x32xf32>
    tpu.vector_store %arg7[%19, %c0_2], %22 {strides = array<i32>} : memref<8x32xf32, #tpu.memory_space<vmem>>, vector<1x32xf32>,
    %c2_i32 = arith.constant 2 : i32
    %23 = arith.addi %0, %c2_i32 : i32
    %24 = arith.index_cast %arg1 : i32 to index
    %25 = arith.index_cast %23 : i32 to index
    %26 = memref.load %arg2[%24, %25] : memref<2x8xi32, #tpu.memory_space<smem>>
    %27 = arith.index_cast %26 : i32 to index
    %c0_3 = arith.constant 0 : index
    %28 = vector.load %arg4[%27, %c0_3] : memref<33x32xf32, #tpu.memory_space<vmem>>, vector<1x32xf32>
    %29 = vector.shape_cast %28 : vector<1x32xf32> to vector<32xf32>
    %30 = arith.index_cast %c2_i32 : i32 to index
    %c0_4 = arith.constant 0 : index
    %31 = vector.load %arg7[%30, %c0_4] : memref<8x32xf32, #tpu.memory_space<vmem>>, vector<1x32xf32>
    %32 = vector.shape_cast %31 : vector<1x32xf32> to vector<32xf32>
    %33 = vector.shape_cast %29 : vector<32xf32> to vector<1x32xf32>
    tpu.vector_store %arg7[%30, %c0_4], %33 {strides = array<i32>} : memref<8x32xf32, #tpu.memory_space<vmem>>, vector<1x32xf32>,
    %c3_i32 = arith.constant 3 : i32
    %34 = arith.addi %0, %c3_i32 : i32
    %35 = arith.index_cast %arg1 : i32 to index
    %36 = arith.index_cast %34 : i32 to index
    %37 = memref.load %arg2[%35, %36] : memref<2x8xi32, #tpu.memory_space<smem>>
    %38 = arith.index_cast %37 : i32 to index
    %c0_5 = arith.constant 0 : index
    %39 = vector.load %arg4[%38, %c0_5] : memref<33x32xf32, #tpu.memory_space<vmem>>, vector<1x32xf32>
    %40 = vector.shape_cast %39 : vector<1x32xf32> to vector<32xf32>
    %41 = arith.index_cast %c3_i32 : i32 to index
    %c0_6 = arith.constant 0 : index
    %42 = vector.load %arg7[%41, %c0_6] : memref<8x32xf32, #tpu.memory_space<vmem>>, vector<1x32xf32>
    %43 = vector.shape_cast %42 : vector<1x32xf32> to vector<32xf32>
    %44 = vector.shape_cast %40 : vector<32xf32> to vector<1x32xf32>
    tpu.vector_store %arg7[%41, %c0_6], %44 {strides = array<i32>} : memref<8x32xf32, #tpu.memory_space<vmem>>, vector<1x32xf32>,
    %c4_i32 = arith.constant 4 : i32
    %45 = arith.addi %0, %c4_i32 : i32
    %46 = arith.index_cast %arg1 : i32 to index
    %47 = arith.index_cast %45 : i32 to index
    %48 = memref.load %arg2[%46, %47] : memref<2x8xi32, #tpu.memory_space<smem>>
    %49 = arith.index_cast %48 : i32 to index
    %c0_7 = arith.constant 0 : index
    %50 = vector.load %arg4[%49, %c0_7] : memref<33x32xf32, #tpu.memory_space<vmem>>, vector<1x32xf32>
    %51 = vector.shape_cast %50 : vector<1x32xf32> to vector<32xf32>
    %52 = arith.index_cast %c4_i32 : i32 to index
    %c0_8 = arith.constant 0 : index
    %53 = vector.load %arg7[%52, %c0_8] : memref<8x32xf32, #tpu.memory_space<vmem>>, vector<1x32xf32>
    %54 = vector.shape_cast %53 : vector<1x32xf32> to vector<32xf32>
    %55 = vector.shape_cast %51 : vector<32xf32> to vector<1x32xf32>
    tpu.vector_store %arg7[%52, %c0_8], %55 {strides = array<i32>} : memref<8x32xf32, #tpu.memory_space<vmem>>, vector<1x32xf32>,
    %c5_i32 = arith.constant 5 : i32
    %56 = arith.addi %0, %c5_i32 : i32
    %57 = arith.index_cast %arg1 : i32 to index
    %58 = arith.index_cast %56 : i32 to index
    %59 = memref.load %arg2[%57, %58] : memref<2x8xi32, #tpu.memory_space<smem>>
    %60 = arith.index_cast %59 : i32 to index
    %c0_9 = arith.constant 0 : index
    %61 = vector.load %arg4[%60, %c0_9] : memref<33x32xf32, #tpu.memory_space<vmem>>, vector<1x32xf32>
    %62 = vector.shape_cast %61 : vector<1x32xf32> to vector<32xf32>
    %63 = arith.index_cast %c5_i32 : i32 to index
    %c0_10 = arith.constant 0 : index
    %64 = vector.load %arg7[%63, %c0_10] : memref<8x32xf32, #tpu.memory_space<vmem>>, vector<1x32xf32>
    %65 = vector.shape_cast %64 : vector<1x32xf32> to vector<32xf32>
    %66 = vector.shape_cast %62 : vector<32xf32> to vector<1x32xf32>
    tpu.vector_store %arg7[%63, %c0_10], %66 {strides = array<i32>} : memref<8x32xf32, #tpu.memory_space<vmem>>, vector<1x32xf32>,
    %c6_i32 = arith.constant 6 : i32
    %67 = arith.addi %0, %c6_i32 : i32
    %68 = arith.index_cast %arg1 : i32 to index
    %69 = arith.index_cast %67 : i32 to index
    %70 = memref.load %arg2[%68, %69] : memref<2x8xi32, #tpu.memory_space<smem>>
    %71 = arith.index_cast %70 : i32 to index
    %c0_11 = arith.constant 0 : index
    %72 = vector.load %arg4[%71, %c0_11] : memref<33x32xf32, #tpu.memory_space<vmem>>, vector<1x32xf32>
    %73 = vector.shape_cast %72 : vector<1x32xf32> to vector<32xf32>
    %74 = arith.index_cast %c6_i32 : i32 to index
    %c0_12 = arith.constant 0 : index
    %75 = vector.load %arg7[%74, %c0_12] : memref<8x32xf32, #tpu.memory_space<vmem>>, vector<1x32xf32>
    %76 = vector.shape_cast %75 : vector<1x32xf32> to vector<32xf32>
    %77 = vector.shape_cast %73 : vector<32xf32> to vector<1x32xf32>
    tpu.vector_store %arg7[%74, %c0_12], %77 {strides = array<i32>} : memref<8x32xf32, #tpu.memory_space<vmem>>, vector<1x32xf32>,
    %c7_i32 = arith.constant 7 : i32
    %78 = arith.addi %0, %c7_i32 : i32
    %79 = arith.index_cast %arg1 : i32 to index
    %80 = arith.index_cast %78 : i32 to index
    %81 = memref.load %arg2[%79, %80] : memref<2x8xi32, #tpu.memory_space<smem>>
    %82 = arith.index_cast %81 : i32 to index
    %c0_13 = arith.constant 0 : index
    %83 = vector.load %arg4[%82, %c0_13] : memref<33x32xf32, #tpu.memory_space<vmem>>, vector<1x32xf32>
    %84 = vector.shape_cast %83 : vector<1x32xf32> to vector<32xf32>
    %85 = arith.index_cast %c7_i32 : i32 to index
    %c0_14 = arith.constant 0 : index
    %86 = vector.load %arg7[%85, %c0_14] : memref<8x32xf32, #tpu.memory_space<vmem>>, vector<1x32xf32>
    %87 = vector.shape_cast %86 : vector<1x32xf32> to vector<32xf32>
    %88 = vector.shape_cast %84 : vector<32xf32> to vector<1x32xf32>
    tpu.vector_store %arg7[%85, %c0_14], %88 {strides = array<i32>} : memref<8x32xf32, #tpu.memory_space<vmem>>, vector<1x32xf32>,
    %c8_i32_15 = arith.constant 8 : i32
    %c0_16 = arith.constant 0 : index
    %c0_17 = arith.constant 0 : index
    %89 = vector.load %arg7[%c0_16, %c0_17] : memref<8x32xf32, #tpu.memory_space<vmem>>, vector<8x32xf32>
    %c0_18 = arith.constant 0 : index
    %c0_19 = arith.constant 0 : index
    %90 = vector.load %arg5[%c0_18, %c0_19] : memref<8x32xf32, #tpu.memory_space<vmem>>, vector<8x32xf32>
    %91 = arith.addf %89, %90 : vector<8x32xf32>
    %c0_20 = arith.constant 0 : index
    %c0_21 = arith.constant 0 : index
    %c0_22 = arith.constant 0 : index
    %92 = vector.load %arg6[%c0_20, %c0_21, %c0_22] : memref<1x8x32xf32, #tpu.memory_space<vmem>>, vector<1x8x32xf32>
    %93 = vector.shape_cast %92 : vector<1x8x32xf32> to vector<8x32xf32>
    %94 = vector.shape_cast %91 : vector<8x32xf32> to vector<1x8x32xf32>
    tpu.vector_store %arg6[%c0_20, %c0_21, %c0_22], %94 {strides = array<i32>} : memref<1x8x32xf32, #tpu.memory_space<vmem>>, vector<1x8x32xf32>,
    return
  }
  func.func @transform_0(%arg0: i32, %arg1: i32, %arg2: memref<2x8xi32, #tpu.memory_space<smem>>, %arg3: memref<1xi32, #tpu.memory_space<smem>>) -> (i32, i32) {
    %c0_i32 = arith.constant 0 : i32
    %c0_i32_0 = arith.constant 0 : i32
    %c0_i32_1 = arith.constant 0 : i32
    return %c0_i32, %c0_i32_0 : i32, i32
  }
  func.func @transform_1(%arg0: i32, %arg1: i32, %arg2: memref<2x8xi32, #tpu.memory_space<smem>>, %arg3: memref<1xi32, #tpu.memory_space<smem>>) -> (i32, i32) {
    %c0_i32 = arith.constant 0 : i32
    %c0_i32_0 = arith.constant 0 : i32
    return %arg0, %c0_i32 : i32, i32
  }
  func.func @transform_2(%arg0: i32, %arg1: i32, %arg2: memref<2x8xi32, #tpu.memory_space<smem>>, %arg3: memref<1xi32, #tpu.memory_space<smem>>) -> (i32, i32, i32) {
    %c0_i32 = arith.constant 0 : i32
    %c0_i32_0 = arith.constant 0 : i32
    return %arg1, %arg0, %c0_i32 : i32, i32, i32
  }
}

</mosaic_0001>

<bundles_post_ra>
// kernel: tpu_custom_call.1
= control target key start
LH: loop header
LB: loop body
LE: loop exit
PB: predicated region body
PF: predicated region fallthrough
CT: control target
= control target key end

     0   :  { %s530_s18 = smov [#allocation4]   ;;  %s687_s0 = inlined_call_operand.vmem [shape: s32[2,8], index: 0, kind: input, shape index: {}]   ;;  %s688_s1 = inlined_call_operand.<no memory space> [shape: s32[1], index: 1, kind: input, shape index: {}]   ;;  %s689_s2 = inlined_call_operand.vmem [shape: f32[33,32], index: 2, kind: input, shape index: {}]   ;;  %s690_s3 = inlined_call_operand.vmem [shape: f32[8,32], index: 3, kind: input, shape index: {}]   ;;  %s691_s4 = inlined_call_operand.hbm [shape: f32[2,8,32], index: 4, kind: output, shape index: {}]  }
   0x1   :  { %s10_s17 = sshll.u32 %s687_s0, 4  ;;  %s11_s17 = int_to_ptr.vmem [resolvable:$true] %s10_s17 }
   0x2   :  { %13 = dma.vmem_to_smem %s11_s17, 32, %s530_s18, [#allocation3] }
   0x3   :  { %500 = dma.done.wait [#allocation3], 32 }
   0x4   :  { %501 = vsyncadd [#allocation3], 4294967264 }
   0x5   :  { %17 = sfence }
   0x6   :  { %18 = vsyncpa [#allocation7], 0 }
   0x7   :  { %20 = vsyncpa [#allocation7 + $0x1], 0  ;;  %s559_s1 = smov 0   ;;  %s561_s19 = smov 0  }
   0x8   :  { %s563_s20 = smov 0   ;;  %s565_s21 = smov 0  }
   0x9   :  { %s567_s22 = smov 0   ;;  %s569_s23 = smov 0  }
   0xa LB: > { %694 = sst [smem:[#allocation10_spill]] %s524_s22  ;;  %s362_s0 = sadd.s32 4294967295, %s528_s23   ;;  %s528_s23 = sphi %s569_s23, %s26_s23   ;;  %s524_s22 = sphi %s567_s22, %s699_s22   ;;  %s520_s21 = sphi %s565_s21, %s698_s21   ;;  %s516_s20 = sphi %s563_s20, %s702_s20   ;;  %s512_s19 = sphi %s561_s19, %s701_s19   ;;  %s508_s1 = sphi %s559_s1, %s700_s1  }
   0xb   : > { %s363_s24 = sadd.s32 4294967294, %s528_s23   ;;  %s35_s25 = sadd.s32 1, %s524_s22 }
   0xc   : > { %s94_s26 = sadd.s32 1, %s516_s20  ;;  %p36_p0 = scmp.ge.s32.totalorder %s35_s25, 2 }
   0xd   : > { %p104_p1 = scmp.ne.s32.totalorder %s516_s20, %s512_s19  ;;  %p105_p2 = scmp.eq.s32.totalorder %s362_s0, 1 }
   0xe   : > { %p110_p3 = scmp.ne.s32.totalorder %s512_s19, %s508_s1  ;;  %s704_s25 = smov (%p36_p0, %s35_s25), 0 }
   0xf   : > { %695 = sst [smem:[#allocation11_spill]] %s704_s25  ;;  %p599_p4 = por %p105_p2, %p104_p1 }
  0x10   : > { %p111_p5 = scmp.eq.s32.totalorder %s363_s24, 1  ;;  %s89_s28 = ssub.s32 %s524_s22, %s704_s25 }
  0x11   : > { %p366_p6 = scmp.ge.s32.totalorder %s528_s23, 1  ;;  %p92_p7 = scmp.eq.s32.totalorder %s89_s28, 0 }
  0x12   : > { %p606_p8 = por %p111_p5, %p110_p3  ;;  %p139_p9 = scmp.lt.s32.totalorder %s528_s23, 3 }
  0x13   : > { %s612_s30 = scalar_select %p92_p7, %s516_s20, %s94_s26  }
  0x14   : > { %p140_p10 = pnand %p366_p6, %p139_p9 }
  0x15   : > { %s368_s5 = sshll.u32 (!%p140_p10), %s520_s21, 7  ;;  %s157_s28 = sand.u32 (!%p140_p10), 1, %s512_s19  }
  0x16   : > { %143 = sbr.rel (%p140_p10) target bundleno = 51 (0x33), region = 28  ;;  %s172_s6 = sld [smem:[#allocation4 + %s368_s5]] (!%p140_p10) }
  0x17   : > { %s184_s7 = sadd.s32 (!%p140_p10), 1, %s368_s5  ;;  %s196_s9 = sadd.s32 (!%p140_p10), 2, %s368_s5 }
  0x18   : > { %s185_s8 = sld [smem:[#allocation4 + %s184_s7]] (!%p140_p10)  ;;  %s208_s11 = sadd.s32 (!%p140_p10), 3, %s368_s5 }
  0x19   : > { %s197_s10 = sld [smem:[#allocation4 + %s196_s9]] (!%p140_p10)  ;;  %s220_s13 = sadd.s32 (!%p140_p10), 4, %s368_s5 }
  0x1a   : > { %s209_s12 = sld [smem:[#allocation4 + %s208_s11]] (!%p140_p10)  ;;  %s232_s15 = sadd.s32 (!%p140_p10), 5, %s368_s5 }
  0x1b   : > { %s221_s14 = sld [smem:[#allocation4 + %s220_s13]]  ;;  %vm175_vm0 = vcmask 253952   ;;  %s244_s17 = sadd.s32 6, %s368_s5  ;;  %v262_v8 = vld [vmem:[%s690_s3] sm:$0xff]  ;;  %vm264_vm1 = vcmask 261120  }
  0x1c   : > { %s233_s16 = sld [smem:[#allocation4 + %s232_s15]]  ;;  %s173_s24 = scalar_lea.vmem %s689_s2, %s172_s6 }
  0x1d   : > { %s245_s26 = sld [smem:[#allocation4 + %s244_s17]]  ;;  %v174_v0 = vld [vmem:[%s173_s24] sm:$0x1]  ;;  %s256_s9 = sadd.s32 7, %s368_s5 }
  0x1e   : > { %s186_s7 = scalar_lea.vmem %s689_s2, %s185_s8  ;;  %176 = vst.msk [vmem:[#allocation2] sm:$0x1] %vm175_vm0, %v174_v0  ;;  %s257_s22 = sld [smem:[#allocation4 + %s256_s9]] }
  0x1f   : > { %v187_v1 = vld [vmem:[%s186_s7] sm:$0x1]  ;;  %s198_s15 = scalar_lea.vmem %s689_s2, %s197_s10  ;;  %s468_s7 = scalar_lea.hbm %s691_s4, 16 }
  0x20   : > { %188 = vst.msk [vmem:[#allocation2 + $0x1] sm:$0x1] %vm175_vm0, %v187_v1  ;;  %v199_v2 = vld [vmem:[%s198_s15] sm:$0x1]  ;;  %s210_s18 = scalar_lea.vmem %s689_s2, %s209_s12  ;;  %s367_s15 = sshll.u32 %s157_s28, 3 }
  0x21   : > { %200 = vst.msk [vmem:[#allocation2 + $0x2] sm:$0x1] %vm175_vm0, %v199_v2  ;;  %v211_v3 = vld [vmem:[%s210_s18] sm:$0x1]  ;;  %s222_s8 = scalar_lea.vmem %s689_s2, %s221_s14 }
  0x22   : > { %212 = vst.msk [vmem:[#allocation2 + $0x3] sm:$0x1] %vm175_vm0, %v211_v3  ;;  %v223_v4 = vld [vmem:[%s222_s8] sm:$0x1]  ;;  %s234_s24 = scalar_lea.vmem %s689_s2, %s233_s16  ;;  %s377_s16 = sshll.u32 %s520_s21, 3 }
  0x23   : > { %224 = vst.msk [vmem:[#allocation2 + $0x4] sm:$0x1] %vm175_vm0, %v223_v4  ;;  %v235_v5 = vld [vmem:[%s234_s24] sm:$0x1]  ;;  %s246_s9 = scalar_lea.vmem %s689_s2, %s245_s26  ;;  %s278_s18 = scalar_lea.hbm %s691_s4, %s377_s16 }
  0x24   : > { %236 = vst.msk [vmem:[#allocation2 + $0x5] sm:$0x1] %vm175_vm0, %v235_v5  ;;  %v247_v6 = vld [vmem:[%s246_s9] sm:$0x1]  ;;  %s258_s13 = scalar_lea.vmem %s689_s2, %s257_s22  ;;  %s159_s26 = scalar_lea.vmem [#allocation6], %s367_s15 }
  0x25   : > { %248 = vst.msk [vmem:[#allocation2 + $0x6] sm:$0x1] %vm175_vm0, %v247_v6  ;;  %v259_v7 = vld [vmem:[%s258_s13] sm:$0x1]  ;;  %s280_s25 = sshll.u32 %s159_s26, 4  ;;  %s282_s10 = sshll.u32 %s278_s18, 4  ;;  %s281_s25 = int_to_ptr.vmem [resolvable:$true] %s280_s25  ;;  %s283_s10 = int_to_ptr.hbm [resolvable:$true] %s282_s10 }
  0x26   : > { %260 = vst.msk [vmem:[#allocation2 + $0x7] sm:$0x1] %vm175_vm0, %v259_v7  ;;  %s267_s21 = scalar_lea.sflag [#allocation7], %s157_s28  ;;  %s462_s22 = sshra.s32 %s283_s10, 4  ;;  %s463_s22 = int_to_ptr.hbm [resolvable:$true] %s462_s22 }
  0x27   : > { %s464_s0 = scalar_lea.hbm %s463_s22, 8  ;;  %p469_p0 = scmp.lt.s32.totalorder %s463_s22, %s691_s4 }
  0x28   : > { %p465_p11 = scmp.ne.s32.totalorder %s463_s22, %s464_s0  ;;  %p470_p1 = scmp.lt.s32.totalorder %s468_s7, %s464_s0 }
  0x2a   : > { %p466_p12 = pnand %p465_p11, %p599_p4  ;;  %p471_p2 = por %p470_p1, %p469_p0 }
  0x2c   : > { %p467_p13 = pneg %p466_p12 }
  0x2d   : > { %v261_v9 = vld [vmem:[#allocation2] sm:$0xff] }
  0x2e   : > { %v263_v10 = vadd.f32 %v262_v8, %v261_v9  ;;  %p472_p3 = pnand %p471_p2, %p467_p13 }
  0x30   : > { %265 = vst.msk [vmem:[%s159_s26] sm:$0xff] %vm264_vm1, %v263_v10 }
  0x31   : > { %475 = shalt.err (!%p472_p3)
}
  0x32   : > { %380 = dma.vmem_to_hbm [thread:$0]  (%p599_p4), %s281_s25, 128, %s283_s10, %s267_s21  }
  0x33 PF: > { %p386_p5 = scmp.ge.s32.totalorder %s528_s23, 2  ;;  %s294_s28 = sand.u32 1, %s508_s1  }
  0x34   : > { %s295_s11 = scalar_lea.sflag [#allocation7], %s294_s28 }
  0x35   : > { %p383_p6 = pnand %p386_p5, %p606_p8 }
  0x37   : > { %p384_p7 = pneg %p383_p6 }
  0x39   : > { %503 = dma.done.wait (%p384_p7), %s295_s11, 128  }
  0x3a   : > { %505 = vsyncadd (%p384_p7), %s295_s11, 4294967168  ;;  %s26_s23 = sadd.s32 1, %s528_s23   ;;  %s698_s21 = sld [smem:[#allocation10_spill]] }
  0x3b   : > { %p23_p9 = scmp.ge.s32.totalorder %s26_s23, 4   ;;  %s699_s22 = sld [smem:[#allocation11_spill]] }
  0x3c   : > { %s700_s1 = smov %s512_s19  ;;  %s701_s19 = smov %s516_s20 }
  0x3d   : > { %s702_s20 = smov %s612_s30  ;;  %25 = sbr.rel (!%p23_p9) target bundleno = 10 (0xa), region = 71 }
  0x42   :  { %301 = vsyncpa [#allocation7], 1 }
  0x43   :  { %303 = vsyncpa [#allocation7 + $0x1], 1 }

</bundles_post_ra>
